<compile_context>
chip_gen: v7x
topology: tpu7x:2x2x1
jax: 0.10.0
libtpu: 0.0.40
codegen_flags: <defaults>
</compile_context>

<pallas_src>
from enum import Enum

import jax
import jax.numpy as jnp
from jax.experimental import pallas as pl
from jax.experimental.pallas import tpu as pltpu


class SuperRunMode(Enum):
    """Enumerations for Super Model Running Mode (mirrors the PyTorch enum)."""
    FullModel = "fullmodel"
    Candidate = "candidate"
    Default = "fullmodel"


# ----------------------------- Pallas kernels -------------------------------
def _linear_kernel_single_k(x_ref, w_ref, b_ref, o_ref):
    """Whole K fits one tile: single MXU pass, no accumulator scratch."""
    o_ref[...] = (
        jnp.dot(x_ref[...], w_ref[...], preferred_element_type=jnp.float32)
        + b_ref[...].astype(jnp.float32)
    ).astype(o_ref.dtype)


def _linear_kernel_multi_k(x_ref, w_ref, b_ref, o_ref, acc_ref):
    """K streamed over grid axis 2 into an f32 VMEM accumulator."""
    k = pl.program_id(2)
    partial = jnp.dot(x_ref[...], w_ref[...], preferred_element_type=jnp.float32)

    @pl.when(k == 0)
    def _():
        # Direct write on the first K step: saves a full (tm, tn) f32
        # zero-init + read-modify-write per output tile.
        acc_ref[...] = partial

    @pl.when(k > 0)
    def _():
        acc_ref[...] = acc_ref[...] + partial

    @pl.when(k == pl.num_programs(2) - 1)
    def _():
        o_ref[...] = (
            acc_ref[...] + b_ref[...].astype(jnp.float32)
        ).astype(o_ref.dtype)


# ----------------------------- tiling helpers -------------------------------
def _round_up(x, m):
    return (x + m - 1) // m * m


def _sublane(dtype):
    itm = jnp.dtype(dtype).itemsize
    return 8 * max(1, 4 // max(1, itm))     # f32 -> 8, bf16 -> 16


def _pick_feature_tiles(in_f, out_f, dtype):
    """tn / tk depend only on the layer shape -> decided once at module init."""
    # N tile: power-of-two multiple of 128 (so it stays halvable for the v7x
    # megacore split), as large as 512 while padding waste stays small.
    tn = 128
    for cand in (512, 256):
        if cand <= _round_up(out_f, 128) and _round_up(out_f, cand) - out_f <= cand // 2:
            tn = cand
            break
    # K tile: exact 128-multiple for small reductions (single K step, no
    # accumulator RMW at all); 512 / 1024 ladder for large IN so the MXU —
    # not the accumulator vld/vst traffic — stays the binding unit.
    if in_f <= 1024:
        tk = max(128, _round_up(in_f, 128))
    elif in_f < 4096 or _round_up(in_f, 1024) - in_f > 512:
        tk = 512
    else:
        tk = 1024
    return tn, tk


def _pick_tm(batch, dtype):
    """M tile: grows with batch up to 512, always a sublane multiple."""
    sub = _sublane(dtype)
    if batch <= 512:
        return _round_up(batch, sub)
    for cand in (512, 256, 128):
        if _round_up(batch, cand) - batch < cand // 2:
            return cand
    return 128


_VMEM_SOFT_BUDGET = 28 * 1024 * 1024        # v7x: 64 MiB physical, 32 MiB default scoped
_VMEM_RAISE_LIMIT_ABOVE = 12 * 1024 * 1024  # v5e default scoped limit is ~16 MiB
_PALLAS_MIN_FLOPS = 1 << 22                 # below this, launch/DMA overhead dominates


def _vmem_tile_bytes(tm, tn, tk, x_itm, w_itm, out_itm, w_bufs):
    return (2 * tm * tk * x_itm             # x double-buffer
            + w_bufs * tk * tn * w_itm      # weight stream (2- or 3-deep)
            + w_bufs * tn * w_itm           # bias tiles (tiny)
            + tm * tn * 4                   # f32 accumulator scratch
            + 2 * tm * tn * out_itm)        # output double-buffer


# ------------------------------ Pallas wrapper -------------------------------
def linear_forward_raw_pallas(x, w_t, b2d, out_features, *, tn, tk):
    """Full-model forward y = x @ w_t + b as a tiled Pallas MXU matmul.

    x    : [B, IN]       activations (padded per call only)
    w_t  : [INp, OUTp]   weight, pre-transposed AND pre-padded at module init
    b2d  : [1, OUTp]     bias, pre-padded at module init
    """
    B, IN = x.shape
    INp, OUTp = w_t.shape
    assert IN <= INp and INp % tk == 0 and OUTp % tn == 0
    assert b2d.shape == (1, OUTp)
    out_dtype = x.dtype
    x_itm = jnp.dtype(x.dtype).itemsize
    w_itm = jnp.dtype(w_t.dtype).itemsize
    b_itm = jnp.dtype(b2d.dtype).itemsize
    out_itm = jnp.dtype(out_dtype).itemsize

    tm = _pick_tm(B, x.dtype)
    # v7x VMEM budget guard (64 MiB physical / 32 MiB default scoped limit).
    while tm > 256 and _vmem_tile_bytes(tm, tn, tk, x_itm, w_itm, out_itm, 3) > _VMEM_SOFT_BUDGET:
        tm //= 2
    Bp = _round_up(B, tm)

    # Only the activations are padded per call (weight/bias were padded once
    # at init; zero K-padding contributes nothing to the dot product).
    if (Bp, INp) != (B, IN):
        x = jnp.pad(x, ((0, Bp - B), (0, INp - IN)))

    grid_m = Bp // tm
    grid_k = INp // tk
    # v7x megacore: if the whole problem fits one (tm, tn) tile, split N so
    # both TensorCores get a block on the "parallel" grid axes.
    if grid_m == 1 and OUTp == tn and tn >= 256:
        tn //= 2
    grid_n = OUTp // tn

    # Deeper weight buffering when tiles are small (v5e: covers exposed DMA
    # latency on the memory-bound weight stream).
    deep_w = (tk * tn * w_itm <= (1 << 20)) and (grid_m * grid_n * grid_k >= 3)
    w_bufs = 3 if deep_w else 2
    vmem_est = _vmem_tile_bytes(tm, tn, tk, x_itm, w_itm, out_itm, w_bufs)

    # Truthful streamed-bytes estimate: include the refetch factors.
    x_bytes = Bp * INp * x_itm * (grid_n if grid_k > 1 else 1)
    w_bytes = INp * OUTp * w_itm * (grid_m if grid_n * grid_k > 1 else 1)
    b_bytes = OUTp * b_itm * grid_m
    o_bytes = Bp * OUTp * out_itm
    cost = pl.CostEstimate(
        flops=int(2 * Bp * INp * OUTp),
        transcendentals=0,
        bytes_accessed=int(x_bytes + w_bytes + b_bytes + o_bytes),
    )

    w_spec_kwargs = {"pipeline_mode": pl.Buffered(3)} if deep_w else {}
    kernel = _linear_kernel_single_k if grid_k == 1 else _linear_kernel_multi_k
    scratch = () if grid_k == 1 else (pltpu.VMEM((tm, tn), jnp.float32),)

    cp_kwargs = dict(dimension_semantics=("parallel", "parallel", "arbitrary"))
    if vmem_est > _VMEM_RAISE_LIMIT_ABOVE:
        cp_kwargs["vmem_limit_bytes"] = 32 * 1024 * 1024

    out = pl.pallas_call(
        kernel,
        out_shape=jax.ShapeDtypeStruct((Bp, OUTp), out_dtype),
        grid_spec=pltpu.PrefetchScalarGridSpec(
            num_scalar_prefetch=0,
            grid=(grid_m, grid_n, grid_k),
            in_specs=[
                pl.BlockSpec((tm, tk), lambda i, j, k: (i, k)),                   # x
                pl.BlockSpec((tk, tn), lambda i, j, k: (k, j), **w_spec_kwargs),  # w
                pl.BlockSpec((1, tn), lambda i, j, k: (0, j)),                    # bias
            ],
            out_specs=pl.BlockSpec((tm, tn), lambda i, j, k: (i, j)),
            scratch_shapes=scratch,
        ),
        compiler_params=pltpu.CompilerParams(**cp_kwargs),
        cost_estimate=cost,
    )(x, w_t, b2d)

    if (Bp, OUTp) != (B, out_features):
        out = out[:B, :out_features]
    return out


def linear_forward(x, w_t, b2d, out_features, *, tn, tk, force_pallas=False):
    B, IN = x.shape
    flops = 2 * B * IN * out_features
    if not force_pallas and flops < _PALLAS_MIN_FLOPS:
        # Tiny layers: launch + DMA overhead dominates a single MXU pass.
        y = jnp.dot(x, w_t[:IN, :out_features],
                    preferred_element_type=jnp.float32) + b2d[0, :out_features]
        return y.astype(x.dtype)
    return linear_forward_raw_pallas(x, w_t, b2d, out_features, tn=tn, tk=tk)


# --------------------------- SuperModule analog ------------------------------
class SuperModuleJAX:
    """JAX analog of SuperModule: dispatch between full-model / candidate."""

    def __init__(self):
        self._super_run_type = SuperRunMode.Default
        self._abstract_child = None
        self._verbose = False

    # --- metadata / bookkeeping (pure Python, no tensor compute) ---
    def set_super_run_type(self, super_run_type):
        self._super_run_type = super_run_type

    def apply_verbose(self, verbose):
        self._verbose = verbose

    @property
    def super_run_type(self):
        return self._super_run_type

    @property
    def abstract_child(self):
        return self._abstract_child

    @property
    def verbose(self):
        return self._verbose

    @property
    def name_with_id(self):
        return "name={:}, id={:}".format(self.__class__.__name__, id(self))

    def get_shape_str(self, tensors):
        if isinstance(tensors, (list, tuple)):
            shapes = [self.get_shape_str(t) for t in tensors]
            return shapes[0] if len(shapes) == 1 else ", ".join(shapes)
        return str(tuple(tensors.shape))

    # --- forward dispatch (mirrors SuperModule.forward exactly) ---
    def forward(self, *inputs):
        if self.verbose:
            print("[{:}] inputs shape: {:}".format(
                self.name_with_id, self.get_shape_str(inputs)))
        if self.super_run_type == SuperRunMode.FullModel:
            outputs = self.forward_raw(*inputs)
        elif self.super_run_type == SuperRunMode.Candidate:
            outputs = self.forward_candidate(*inputs)
        else:
            raise RuntimeError(
                "Unknown Super Model Run Mode: {:}".format(self.super_run_type))
        if self.verbose:
            print("[{:}] outputs shape: {:}".format(
                self.name_with_id, self.get_shape_str(outputs)))
        return outputs

    __call__ = forward

    def forward_raw(self, *inputs):
        raise NotImplementedError

    def forward_candidate(self, *inputs):
        raise NotImplementedError


class SuperLinearDemo(SuperModuleJAX):
    """Concrete subclass: forward_raw is an affine map executed in Pallas."""

    def __init__(self, in_features, out_features, key, *, dtype=jnp.float32,
                 force_pallas=True):
        super().__init__()
        self.in_features = in_features
        self.out_features = out_features
        self._force_pallas = force_pallas

        k_w, k_b = jax.random.split(key)
        bound = 1.0 / float(in_features) ** 0.5
        w = jax.random.uniform(k_w, (out_features, in_features),
                               jnp.float32, -bound, bound).astype(dtype)
        b = jax.random.uniform(k_b, (out_features,),
                               jnp.float32, -bound, bound).astype(dtype)

        # Perf-review #1: transpose + zero-pad ONCE at init so every forward
        # only pads the activations; the Pallas call is the sole consumer of W.
        tn, tk = _pick_feature_tiles(in_features, out_features, dtype)
        self._tn, self._tk = tn, tk
        inp = _round_up(in_features, tk)
        outp = _round_up(out_features, tn)
        self.w_t = jnp.pad(jnp.transpose(w),
                           ((0, inp - in_features), (0, outp - out_features)))
        self.b = jnp.pad(b, (0, outp - out_features)).reshape(1, outp)

    def forward_raw(self, x):
        return linear_forward(x, self.w_t, self.b, self.out_features,
                              tn=self._tn, tk=self._tk,
                              force_pallas=self._force_pallas)

    def forward_candidate(self, x):
        # TODO(synk): Candidate (sub-network) mode depends on the abstract
        # search-space child (spaces.VirtualNode), which is abstract in
        # SuperModule; fall back to the full model here.
        return self.forward_raw(x)


# ----------------------------------- demo -----------------------------------
if __name__ == "__main__":
    key = jax.random.PRNGKey(0)
    keys = jax.random.split(key, 8)

    def _check(mod, x, tol):
        y = jax.block_until_ready(mod(x))
        IN, OUT = mod.in_features, mod.out_features
        w_t = mod.w_t[:IN, :OUT].astype(jnp.float32)
        b = mod.b[0, :OUT].astype(jnp.float32)
        ref = jnp.dot(x.astype(jnp.float32), w_t,
                      precision=jax.lax.Precision.HIGHEST) + b
        assert y.shape == (x.shape[0], OUT), (y.shape, (x.shape[0], OUT))
        err = float(jnp.max(jnp.abs(y.astype(jnp.float32) - ref)))
        assert jnp.allclose(y.astype(jnp.float32), ref, atol=tol, rtol=tol), err
        return y

    # Case 1: small shapes — single-K kernel, padding on every axis, 1x1x1 grid.
    x1 = jax.random.normal(keys[0], (8, 64), jnp.float32)
    mod1 = SuperLinearDemo(64, 32, keys[1])
    mod1.set_super_run_type(SuperRunMode.FullModel)   # default dispatch path
    _check(mod1, x1, 5e-4)

    # Case 2: single-K, exercises the v7x megacore N split (tn 256 -> 128).
    x2 = jax.random.normal(keys[2], (16, 384), jnp.float32)
    mod2 = SuperLinearDemo(384, 256, keys[3])
    _check(mod2, x2, 5e-4)

    # Case 3: multi-step K reduction (tk=512, 3 K steps) with f32 accumulator
    # scratch and a Buffered(3) weight stream.
    x3 = jax.random.normal(keys[4], (8, 1280), jnp.float32)
    mod3 = SuperLinearDemo(1280, 384, keys[5])
    _check(mod3, x3, 1e-3)

    # Case 4: bf16 operands straight into the MXU with f32 accumulation
    # (16-row sublane packing path).
    x4 = jax.random.normal(keys[6], (4, 256), jnp.float32).astype(jnp.bfloat16)
    mod4 = SuperLinearDemo(256, 192, keys[7], dtype=jnp.bfloat16)
    _check(mod4, x4, 2e-2)

    print("KERNEL_OK")
</pallas_src>

<mosaic_0001>
module attributes {stable_mosaic.version = 11 : i64} {
  func.func @_linear_kernel_single_k(%arg0: i32, %arg1: i32, %arg2: i32, %arg3: memref<8x128xf32, #tpu.memory_space<vmem>>, %arg4: memref<128x128xf32, #tpu.memory_space<vmem>>, %arg5: memref<1x128xf32, #tpu.memory_space<vmem>>, %arg6: memref<8x128xf32, #tpu.memory_space<vmem>>) attributes {dimension_semantics = [#tpu.dimension_semantics<parallel>, #tpu.dimension_semantics<parallel>, #tpu.dimension_semantics<arbitrary>], iteration_bounds = array<i64: 1, 1, 1>, scalar_prefetch = 0 : i64, scratch_operands = 0 : i64, tpu.core_type = #tpu.core_type<tc>, window_params = [{transform_indices = @transform_0, window_bounds = array<i64: 8, 128>}, {transform_indices = @transform_1, window_bounds = array<i64: 128, 128>}, {transform_indices = @transform_2, window_bounds = array<i64: 1, 128>}, {transform_indices = @transform_3, window_bounds = array<i64: 8, 128>}]} {
    %c0 = arith.constant 0 : index
    %c0_0 = arith.constant 0 : index
    %0 = vector.load %arg3[%c0, %c0_0] : memref<8x128xf32, #tpu.memory_space<vmem>>, vector<8x128xf32>
    %c0_1 = arith.constant 0 : index
    %c0_2 = arith.constant 0 : index
    %1 = vector.load %arg4[%c0_1, %c0_2] : memref<128x128xf32, #tpu.memory_space<vmem>>, vector<128x128xf32>
    %cst = arith.constant dense<0.000000e+00> : vector<8x128xf32>
    %2 = tpu.matmul %0, %1, %cst {dimension_numbers = #tpu.dot_dimension_numbers<[1], [0], [0], [1], [0, 0, 1, 1], [], []>} : vector<8x128xf32>, vector<128x128xf32>, vector<8x128xf32> -> vector<8x128xf32>
    %c0_3 = arith.constant 0 : index
    %c0_4 = arith.constant 0 : index
    %3 = vector.load %arg5[%c0_3, %c0_4] : memref<1x128xf32, #tpu.memory_space<vmem>>, vector<1x128xf32>
    %4 = vector.broadcast %3 : vector<1x128xf32> to vector<8x128xf32>
    %5 = arith.addf %2, %4 : vector<8x128xf32>
    %c0_5 = arith.constant 0 : index
    %c0_6 = arith.constant 0 : index
    %6 = vector.load %arg6[%c0_5, %c0_6] : memref<8x128xf32, #tpu.memory_space<vmem>>, vector<8x128xf32>
    tpu.vector_store %arg6[%c0_5, %c0_6], %5 {strides = array<i32>} : memref<8x128xf32, #tpu.memory_space<vmem>>, vector<8x128xf32>,
    return
  }
  func.func @transform_0(%arg0: i32, %arg1: i32, %arg2: i32) -> (i32, i32) {
    %c0_i32 = arith.constant 0 : i32
    return %arg0, %arg2 : i32, i32
  }
  func.func @transform_1(%arg0: i32, %arg1: i32, %arg2: i32) -> (i32, i32) {
    %c0_i32 = arith.constant 0 : i32
    return %arg2, %arg1 : i32, i32
  }
  func.func @transform_2(%arg0: i32, %arg1: i32, %arg2: i32) -> (i32, i32) {
    %c0_i32 = arith.constant 0 : i32
    %c0_i32_0 = arith.constant 0 : i32
    return %c0_i32, %arg1 : i32, i32
  }
  func.func @transform_3(%arg0: i32, %arg1: i32, %arg2: i32) -> (i32, i32) {
    %c0_i32 = arith.constant 0 : i32
    return %arg0, %arg1 : i32, i32
  }
}

</mosaic_0001>

<bundles_post_ra>
// kernel: tpu_custom_call.1
= control target key start
LH: loop header
LB: loop body
LE: loop exit
PB: predicated region body
PF: predicated region fallthrough
CT: control target
= control target key end

     0   :  { %8 = vsyncpa [#allocation3], 0  ;;  %s383_s0 = inlined_call_operand.hbm [shape: f32[8,128], index: 0, kind: input, shape index: {}]   ;;  %s384_s1 = inlined_call_operand.hbm [shape: f32[128,128], index: 1, kind: input, shape index: {}]   ;;  %s385_s2 = inlined_call_operand.vmem [shape: f32[1,128], index: 2, kind: input, shape index: {}]   ;;  %s386_s3 = inlined_call_operand.hbm [shape: f32[8,128], index: 3, kind: output, shape index: {}]  }
   0x1   :  { %9 = vsyncpa [#allocation6], 0 }
   0x2   :  { %10 = vsyncpa [#allocation4], 0  ;;  %s309_s12 = smov [#allocation2]   ;;  %s310_s14 = smov [#allocation5]  }
   0x3   :  { %s17_s13 = sshll.u32 %s309_s12, 4  ;;  %s26_s15 = sshll.u32 %s310_s14, 4  ;;  %s18_s13 = int_to_ptr.vmem [resolvable:$true] %s17_s13  ;;  %s337_s15 = int_to_ptr.vmem [resolvable:$true] %s26_s15 }
   0x4   :  { %s237_s18 = scalar_lea.hbm %s383_s0, 128 }
   0x5   :  { %p238_p0 = scmp.ne.s32.totalorder %s383_s0, %s237_s18  ;;  %p241_p1 = scmp.lt.u32.totalorder %s237_s18, %s383_s0 }
   0x7   :  { %p243_p2 = pnand %p241_p1, %p238_p0 }
   0x9   :  { %246 = shalt.err (!%p243_p2)
}
   0xa   :  { %s247_s23 = scalar_lea.vmem %s18_s13, 128  ;;  %p252_p4 = scmp.lt.s32.totalorder %s18_s13, %s18_s13 }
   0xb   :  { %p248_p3 = scmp.ne.s32.totalorder %s18_s13, %s247_s23  ;;  %p253_p5 = scmp.lt.s32.totalorder %s247_s23, %s247_s23 }
   0xd   :  { %p254_p6 = por %p253_p5, %p252_p4 }
   0xf   :  { %p255_p7 = pnand %p254_p6, %p248_p3 }
  0x11   :  { %258 = shalt.err (!%p255_p7)
}
  0x12   :  { %20 = dma.hbm_to_vmem [thread:$0]  %s383_s0, 128, %s18_s13, [#allocation3]  }
  0x13   :  { %s259_s28 = scalar_lea.hbm %s384_s1, 2048 }
  0x14   :  { %p260_p8 = scmp.ne.s32.totalorder %s384_s1, %s259_s28  ;;  %p263_p9 = scmp.lt.u32.totalorder %s259_s28, %s384_s1 }
  0x16   :  { %p265_p10 = pnand %p263_p9, %p260_p8 }
  0x18   :  { %268 = shalt.err (!%p265_p10)
}
  0x19   :  { %s269_s6 = scalar_lea.vmem %s337_s15, 2048  ;;  %p274_p12 = scmp.lt.s32.totalorder %s337_s15, %s337_s15 }
  0x1a   :  { %p270_p11 = scmp.ne.s32.totalorder %s337_s15, %s269_s6  ;;  %p275_p13 = scmp.lt.s32.totalorder %s269_s6, %s269_s6 }
  0x1c   :  { %p276_p0 = por %p275_p13, %p274_p12 }
  0x1e   :  { %p277_p1 = pnand %p276_p0, %p270_p11 }
  0x20   :  { %280 = shalt.err (!%p277_p1)
}
  0x21   :  { %s311_s0 = smov 128   ;;  %s312_s7 = smov 8  }
  0x22   :  { %32 = dma.hbm_to_vmem [thread:$0]  %s384_s1, 2048, %s337_s15, [#allocation6], %s311_s0, %s311_s0, %s312_s7  }
  0x23   :  { %303 = dma.done.wait [#allocation3], 128  }
  0x24   :  { %304 = vsyncadd [#allocation3], 4294967168 }
  0x25   :  { %305 = dma.done.wait [#allocation6], 2048  }
  0x26   :  { %306 = vsyncadd [#allocation6], 4294965248  ;;  %v313_v0 = vmov 0.0|0.0   ;;  %vm314_vm0 = vmmov 0   ;;  %v315_v1 = vmov 0.0   ;;  %v42_v2 = vld [vmem:[#allocation5] sm:$0xff] }
  0x27   :  { %205 = vmatprep.subr.bf16.mxu0 %v313_v0  ;;  %202 = vmatprep.mubr.msk.f32.mxu0 %vm314_vm0, %v315_v1  ;;  %v43_v3 = vld [vmem:[#allocation5 + $0x8] sm:$0xff]  ;;  %v44_v4 = vld [vmem:[#allocation5 + $0x10] sm:$0xff]  ;;  %v45_v6 = vld [vmem:[#allocation5 + $0x18] sm:$0xff]  ;;  %s316_s11 = smov [#allocation7]  }
  0x28   :  { %v206_v5 = vpack.c.bf16 %v43_v3, %v42_v2  ;;  %v209_v7 = vpack.c.bf16 %v45_v6, %v44_v4  ;;  %v46_v8 = vld [vmem:[#allocation5 + $0x20] sm:$0xff]  ;;  %v47_v9 = vld [vmem:[#allocation5 + $0x28] sm:$0xff]  ;;  %v48_v11 = vld [vmem:[#allocation5 + $0x30] sm:$0xff]  ;;  %s142_s12 = sshll.u32 %s316_s11, 4  ;;  %s143_s12 = int_to_ptr.vmem [resolvable:$true] %s142_s12 }
  0x29   :  { %v212_v10 = vpack.c.bf16 %v47_v9, %v46_v8  ;;  %v49_v12 = vld [vmem:[#allocation5 + $0x38] sm:$0xff]  ;;  %v50_v14 = vld [vmem:[#allocation5 + $0x40] sm:$0xff]  ;;  %v51_v15 = vld [vmem:[#allocation5 + $0x48] sm:$0xff]  ;;  %s281_s13 = scalar_lea.vmem %s143_s12, 128  ;;  %p286_p3 = scmp.lt.s32.totalorder %s143_s12, %s143_s12 }
  0x2a   :  { %207 = vmatpush3.bf16.msra.mxu0 %v206_v5  ;;  %v215_v13 = vpack.c.bf16 %v49_v12, %v48_v11  ;;  %v218_v16 = vpack.c.bf16 %v51_v15, %v50_v14  ;;  %v52_v17 = vld [vmem:[#allocation5 + $0x50] sm:$0xff]  ;;  %v53_v18 = vld [vmem:[#allocation5 + $0x58] sm:$0xff]  ;;  %v54_v20 = vld [vmem:[#allocation5 + $0x60] sm:$0xff]  ;;  %p282_p2 = scmp.ne.s32.totalorder %s143_s12, %s281_s13  ;;  %p287_p4 = scmp.lt.s32.totalorder %s281_s13, %s281_s13 }
  0x2b   :  { %208 = vmatprep.subr.bf16.mxu0 %v313_v0  ;;  %v221_v19 = vpack.c.bf16 %v53_v18, %v52_v17  ;;  %v55_v21 = vld [vmem:[#allocation5 + $0x68] sm:$0xff]  ;;  %v56_v23 = vld [vmem:[#allocation5 + $0x70] sm:$0xff]  ;;  %v57_v24 = vld [vmem:[#allocation5 + $0x78] sm:$0xff] }
  0x2c   :  { %v224_v22 = vpack.c.bf16 %v55_v21, %v54_v20  ;;  %v227_v25 = vpack.c.bf16 %v57_v24, %v56_v23  ;;  %v41_v26 = vld [vmem:[#allocation2] sm:$0xff]  ;;  %p288_p5 = por %p287_p4, %p286_p3 }
  0x2d   :  { %v152_v27 = vld [vmem:[%s385_s2] ss:$0 sm:$0xff] }
  0x2e   :  { %210 = vmatpush3.bf16.msra.mxu0 %v209_v7  ;;  %p289_p6 = pnand %p288_p5, %p282_p2 }
  0x2f   :  { %211 = vmatprep.subr.bf16.mxu0 %v313_v0 }
  0x32   :  { %213 = vmatpush3.bf16.msra.mxu0 %v212_v10 }
  0x33   :  { %214 = vmatprep.subr.bf16.mxu0 %v313_v0 }
  0x36   :  { %216 = vmatpush3.bf16.msra.mxu0 %v215_v13 }
  0x37   :  { %217 = vmatprep.subr.bf16.mxu0 %v313_v0 }
  0x3a   :  { %219 = vmatpush3.bf16.msra.mxu0 %v218_v16 }
  0x3b   :  { %220 = vmatprep.subr.bf16.mxu0 %v313_v0 }
  0x3e   :  { %222 = vmatpush3.bf16.msra.mxu0 %v221_v19 }
  0x3f   :  { %223 = vmatprep.subr.bf16.mxu0 %v313_v0 }
  0x42   :  { %225 = vmatpush3.bf16.msra.mxu0 %v224_v22 }
  0x43   :  { %226 = vmatprep.subr.bf16.mxu0 %v313_v0 }
  0x46   :  { %228 = vmatpush3.bf16.msra.mxu0 %v227_v25 }
  0x49   :  { %203 = vmatmul.mubr.f32.vlgmr.msra.gmra.mrb[0].mxu0 %v41_v26 }
 0x11c   :  { %v131_v28 = vpop.f32.mrb[0].mxu0 }
 0x11d   :  { %v132_v29 = vadd.f32 %v152_v27, %v131_v28  ;;  %v204_v30 = vpop.f32.mrb[1].mxu0 }
 0x11f   :  { %135 = vst [vmem:[#allocation7] sm:$0xff] %v132_v29 }
 0x120   :  { %292 = shalt.err (!%p289_p6)
}
 0x121   :  { %s293_s16 = scalar_lea.hbm %s386_s3, 128 }
 0x122   :  { %p294_p7 = scmp.ne.s32.totalorder %s386_s3, %s293_s16  ;;  %p297_p8 = scmp.lt.u32.totalorder %s293_s16, %s386_s3 }
 0x124   :  { %p299_p9 = pnand %p297_p8, %p294_p7 }
 0x126   :  { %302 = shalt.err (!%p299_p9)
}
 0x127   :  { %145 = dma.vmem_to_hbm [thread:$0]  %s143_s12, 128, %s386_s3, [#allocation4]  }
 0x128   :  { %307 = dma.done.wait [#allocation4], 128  }
 0x129   :  { %308 = vsyncadd [#allocation4], 4294967168 }
 0x12a   :  { %149 = vsyncpa [#allocation3], 1 }
 0x12b   :  { %150 = vsyncpa [#allocation6], 1 }
 0x12c   :  { %151 = vsyncpa [#allocation4], 1 }

</bundles_post_ra>
